<compile_context>
chip_gen: v6e
topology: v6e:2x2x1
jax: 0.10.0
libtpu: 0.0.40
codegen_flags: <defaults>
</compile_context>

<pallas_src>
import jax
import jax.numpy as jnp
import numpy as np
from jax.experimental import pallas as pl
from jax.experimental.pallas import tpu as pltpu


# ----------------------------------------------------------------------------
# Pass 1: attention path  ->  mattn = softmax(...) @ align_conv,  shape (B, E)
# ----------------------------------------------------------------------------
def attention_kernel(x_ref, w_ih_ref, b_ref, w_att_ref, b_att_ref, ac_ref,
                     mattn_ref):
    x = x_ref[...].astype(jnp.float32)                    # (tb, in_dim)
    tb = x.shape[0]
    H = w_ih_ref.shape[1]
    E = ac_ref.shape[0]

    # AdaptiveAvgPool1d(1) over in_dim
    s = jnp.mean(x, axis=-1, keepdims=True)               # (tb, 1)

    # single-step tanh RNN (input_size = 1, h0 = 0): broadcast-mul on the VPU
    h = jnp.tanh(s * w_ih_ref[...] + b_ref[...])          # (tb, H)
    h = jnp.maximum(h, 0.0)                               # ReLU

    # Linear(H, E): tiny -> keep it off the MXU (would be >95% padding)
    logits = jnp.zeros((tb, E), jnp.float32) + b_att_ref[...]
    for hh in range(H):                                   # H == 8, static
        logits = logits + h[:, hh:hh + 1] * w_att_ref[hh:hh + 1, :]

    # softmax (max-subtracted); EUP reciprocal + one Newton step keeps full
    # f32 accuracy while using the otherwise-idle EUP slot.
    logits = logits - jnp.max(logits, axis=-1, keepdims=True)
    p = jnp.exp(logits)
    d = jnp.sum(p, axis=-1, keepdims=True)
    r = pl.reciprocal(d, approx=True)
    r = r * (2.0 - d * r)
    attn = p * r                                          # (tb, E)

    # fold the 1x1 align conv: mattn = attn @ align_conv (E x E, tiny -> VPU)
    mattn = jnp.zeros((tb, E), jnp.float32)
    for ee in range(E):                                   # E small, static
        mattn = mattn + attn[:, ee:ee + 1] * ac_ref[ee:ee + 1, :]
    mattn_ref[...] = mattn


# ----------------------------------------------------------------------------
# Pass 2: fused expert matmul (tiled, pipelined)
#   grid = (B/tm, out/tn, in/tk, E); expert axis innermost so the x block
#   index (i, k) is constant across the inner loop (x fetched once per k).
# ----------------------------------------------------------------------------
def _expert_scale(mattn_ref, e):
    # one-hot select of column e of the (tm, E) attention tile (tiny: E lanes)
    m = mattn_ref[...]                                            # (tm, E) f32
    col = jax.lax.broadcasted_iota(jnp.int32, m.shape, 1)
    return jnp.sum(jnp.where(col == e, m, 0.0), axis=1, keepdims=True)


def _fused_dot(x_ref, w_ref):
    # Contraction on the last axis of BOTH operands -> consumes the PyTorch
    # (E, out, in) weight layout directly (native trans-B MXU path; verify
    # with pl.lower_as_mlir that no per-tile vxpose is emitted if perf drops).
    return jax.lax.dot_general(
        x_ref[...], w_ref[...],
        dimension_numbers=(((1,), (1,)), ((), ())),
        preferred_element_type=jnp.float32)


def fuse_matmul_kernel_direct(mattn_ref, x_ref, w_ref, y_ref):
    """f32 output: accumulate directly into the resident output block."""
    k = pl.program_id(2)
    e = pl.program_id(3)

    @pl.when((k == 0) & (e == 0))
    def _init():
        y_ref[...] = jnp.zeros_like(y_ref)

    scale = _expert_scale(mattn_ref, e)                          # (tm, 1)
    # Apply the expert scale to the f32 dot output (not to x): one tm*tn
    # multiply on the already-resident accumulator, no casts of the big tile.
    y_ref[...] += scale * _fused_dot(x_ref, w_ref)


def fuse_matmul_kernel_scratch(mattn_ref, x_ref, w_ref, y_ref, acc_ref):
    """non-f32 output: f32 VMEM accumulator + finalize cast."""
    k = pl.program_id(2)
    e = pl.program_id(3)

    @pl.when((k == 0) & (e == 0))
    def _init():
        acc_ref[...] = jnp.zeros_like(acc_ref)

    scale = _expert_scale(mattn_ref, e)
    acc_ref[...] += scale * _fused_dot(x_ref, w_ref)

    @pl.when((k == pl.num_programs(2) - 1) & (e == pl.num_programs(3) - 1))
    def _finalize():
        y_ref[...] = acc_ref[...].astype(y_ref.dtype)


# ----------------------------------------------------------------------------
# Wrapper
# ----------------------------------------------------------------------------
def _pick_tile(dim, preferred, align):
    """Largest tile <= preferred that is a multiple of `align` and divides
    `dim`; falls back to the full dimension (full-extent blocks are legal)."""
    if dim <= preferred:
        return dim
    t = (preferred // align) * align
    while t >= align:
        if dim % t == 0:
            return t
        t -= align
    return dim


def fuse_layer(x, weight, align_conv, w_ih, b_ih, b_hh, w_att, b_att,
               *, tm=None, tn=None, tk=None, compute_dtype=jnp.bfloat16):
    """FuseLayer forward (linear, no bias, align=True).

    x:          (B, in_dim)
    weight:     (E, out_dim, in_dim)   -- PyTorch parameter layout, used as-is
    align_conv: (E, E) or (E, E, 1, 1) -- 1x1 conv mixing matrix
    w_ih (H,1), b_ih (H,), b_hh (H,)   -- the external single-step tanh RNN
    w_att (E,H), b_att (E,)            -- attention_down Linear(8, E)

    Pass 2 defaults to bf16 compute with f32 accumulation (pass
    compute_dtype=jnp.float32 for the exact path); storing bf16 weights avoids
    the per-call cast of the big weight.
    """
    B, in_dim = x.shape
    E, out_dim, _ = weight.shape
    H = w_ih.shape[0]
    out_dtype = x.dtype

    # tiny parameter-layout glue (negligible tensors; the big expert weight is
    # NOT transposed or copied in the wrapper)
    ac = align_conv.reshape(E, E).astype(jnp.float32)
    w_ih_t = w_ih.reshape(1, H).astype(jnp.float32)       # W_ih^T (input_size=1)
    b_rnn = (b_ih + b_hh).reshape(1, H).astype(jnp.float32)
    w_att_t = jnp.transpose(w_att).astype(jnp.float32)    # (H, E), tiny
    b_att_r = b_att.reshape(1, E).astype(jnp.float32)

    # ---- pass 1: attention path (tiny, O(B*in) work, x in native dtype) ----
    # Bound the (tm1, in_dim) block so double-buffered pass-1 VMEM stays small
    # even for large in_dim (v5e scoped default is only ~16 MiB).
    x_itemsize = np.dtype(x.dtype).itemsize
    tm1_budget = max(8, ((4 << 20) // max(1, in_dim * x_itemsize)) // 8 * 8)
    tm1 = _pick_tile(B, min(256, tm1_budget), 8)
    # TODO(synk): for extremely large in_dim also tile the pass-1 reduction
    #             over in_dim instead of relying on a small batch tile.

    mattn = pl.pallas_call(
        attention_kernel,
        out_shape=jax.ShapeDtypeStruct((B, E), jnp.float32),
        grid=(B // tm1,),
        in_specs=[
            pl.BlockSpec((tm1, in_dim), lambda i: (i, 0)),
            pl.BlockSpec((1, H), lambda i: (0, 0)),
            pl.BlockSpec((1, H), lambda i: (0, 0)),
            pl.BlockSpec((H, E), lambda i: (0, 0)),
            pl.BlockSpec((1, E), lambda i: (0, 0)),
            pl.BlockSpec((E, E), lambda i: (0, 0)),
        ],
        out_specs=pl.BlockSpec((tm1, E), lambda i: (i, 0)),
        compiler_params=pltpu.CompilerParams(
            dimension_semantics=("parallel",)),
    )(x, w_ih_t, b_rnn, w_att_t, b_att_r, ac)

    # ---- pass 2 tile selection ----
    cd_itemsize = np.dtype(compute_dtype).itemsize
    tm = _pick_tile(B, 256 if tm is None else tm, 8)
    if tk is None:
        # collapse the k axis when the whole reduction fits comfortably
        tk = in_dim if in_dim <= 2048 else (1024 if cd_itemsize <= 2 else 512)
    tk = _pick_tile(in_dim, tk, 128)
    tn = _pick_tile(out_dim, 512 if tn is None else tn, 128)

    # v7x has 2 TensorCores: make sure the parallel grid extent (nm*nn) is
    # >= 2 when possible so both cores get work.
    if (B // tm) * (out_dim // tn) < 2:
        for cand in (tn // 2, tn // 4):
            if cand >= 128 and cand % 128 == 0 and out_dim % cand == 0:
                tn = cand
                break

    nm, nn, nk = B // tm, out_dim // tn, in_dim // tk
    direct_acc = (out_dtype == jnp.float32)

    # VMEM footprint estimate (double-buffered inputs/outputs + accumulator);
    # raise the scoped limit only when needed, capped below v7x's 64 MiB.
    mlanes = max(E, 128)
    est = (2 * (tm * tk * cd_itemsize + tn * tk * cd_itemsize
                + tm * mlanes * 4 + tm * tn * np.dtype(out_dtype).itemsize)
           + (0 if direct_acc else tm * tn * 4))
    vmem_limit = None
    if est > (12 << 20):
        vmem_limit = min(int(est * 3 // 2) + (4 << 20), 56 << 20)

    # ---- pass 2: fused expert matmul (tiled, pipelined, MXU-bound) ----
    x_mm = x if x.dtype == compute_dtype else x.astype(compute_dtype)
    w_mm = weight if weight.dtype == compute_dtype else weight.astype(compute_dtype)

    kernel = fuse_matmul_kernel_direct if direct_acc else fuse_matmul_kernel_scratch
    scratch = () if direct_acc else (pltpu.VMEM((tm, tn), jnp.float32),)

    y = pl.pallas_call(
        kernel,
        out_shape=jax.ShapeDtypeStruct((B, out_dim), out_dtype),
        grid=(nm, nn, nk, E),
        in_specs=[
            pl.BlockSpec((tm, E), lambda i, j, k, e: (i, 0)),            # mattn
            pl.BlockSpec((tm, tk), lambda i, j, k, e: (i, k)),           # x
            pl.BlockSpec((None, tn, tk), lambda i, j, k, e: (e, j, k)),  # weight
        ],
        out_specs=pl.BlockSpec((tm, tn), lambda i, j, k, e: (i, j)),
        scratch_shapes=scratch,
        compiler_params=pltpu.CompilerParams(
            dimension_semantics=("parallel", "parallel",
                                 "arbitrary", "arbitrary"),
            vmem_limit_bytes=vmem_limit),
    )(mattn, x_mm, w_mm)
    return y


# ----------------------------------------------------------------------------
# Pure-JAX reference (mirror of the PyTorch forward: linear, no bias, align)
# ----------------------------------------------------------------------------
def fuse_layer_reference(x, weight, align_conv, w_ih, b_ih, b_hh, w_att, b_att):
    E = weight.shape[0]
    s = jnp.mean(x, axis=-1, keepdims=True)                  # AdaptiveAvgPool1d(1)
    h = jnp.tanh(s @ w_ih.T + b_ih + b_hh)                   # rnn, 1 step, h0=0
    logits = jnp.maximum(h, 0.0) @ w_att.T + b_att
    attn = jax.nn.softmax(logits, axis=-1)
    ac = align_conv.reshape(E, E)
    aligned = jnp.einsum('ef,foi->eoi', ac, weight)          # 1x1 conv2d
    fuse_w = jnp.einsum('be,eoi->boi', attn, aligned)
    return jnp.einsum('bi,boi->bo', x, fuse_w)


if __name__ == "__main__":
    B, in_dim, out_dim, E, H = 8, 256, 256, 4, 8
    key = jax.random.PRNGKey(0)
    ks = jax.random.split(key, 8)

    x = jax.random.normal(ks[0], (B, in_dim), jnp.float32)
    weight = 0.05 * jax.random.normal(ks[1], (E, out_dim, in_dim), jnp.float32)
    # align_conv initialized as identity (as in the module) + small perturbation
    # so the mixing path is actually exercised.
    align_conv = (jnp.eye(E, dtype=jnp.float32)
                  + 0.05 * jax.random.normal(ks[2], (E, E), jnp.float32))
    w_ih = jax.random.normal(ks[3], (H, 1), jnp.float32)
    b_ih = 0.1 * jax.random.normal(ks[4], (H,), jnp.float32)
    b_hh = 0.1 * jax.random.normal(ks[5], (H,), jnp.float32)
    w_att = 0.5 * jax.random.normal(ks[6], (E, H), jnp.float32)
    b_att = jnp.zeros((E,), jnp.float32)

    y_ref = fuse_layer_reference(x, weight, align_conv, w_ih, b_ih, b_hh,
                                 w_att, b_att)

    # 1) exact f32 compute path (auto tiles; f32 output -> direct accumulation
    #    into the output block, no scratch)
    y_f32 = fuse_layer(x, weight, align_conv, w_ih, b_ih, b_hh, w_att, b_att,
                       compute_dtype=jnp.float32)
    y_f32 = jax.block_until_ready(y_f32)
    assert y_f32.shape == (B, out_dim)
    assert np.allclose(np.asarray(y_f32), np.asarray(y_ref),
                       atol=1e-4, rtol=1e-4), \
        "Pallas kernel (f32) does not match reference"

    # 2) default bf16 MXU fast path (f32 accumulation, f32 output)
    y_bf = fuse_layer(x, weight, align_conv, w_ih, b_ih, b_hh, w_att, b_att)
    y_bf = jax.block_until_ready(y_bf)
    assert y_bf.shape == (B, out_dim)
    assert np.allclose(np.asarray(y_bf), np.asarray(y_ref),
                       atol=5e-2, rtol=5e-2), \
        "Pallas kernel (bf16 compute) does not match reference"

    # 3) bf16 input/output + explicit small tiles: exercises nk > 1
    #    (grid = 1 x 2 x 2 x 4) and the f32-scratch accumulator path.
    x_bf16 = x.astype(jnp.bfloat16)
    y_bf16 = fuse_layer(x_bf16, weight, align_conv, w_ih, b_ih, b_hh,
                        w_att, b_att, tm=8, tn=128, tk=128)
    y_bf16 = jax.block_until_ready(y_bf16)
    y_ref3 = fuse_layer_reference(x_bf16.astype(jnp.float32), weight,
                                  align_conv, w_ih, b_ih, b_hh, w_att, b_att)
    assert y_bf16.shape == (B, out_dim)
    assert np.allclose(np.asarray(y_bf16, dtype=np.float32),
                       np.asarray(y_ref3), atol=1e-1, rtol=1e-1), \
        "Pallas kernel (bf16 io) does not match reference"

    print("KERNEL_OK")
</pallas_src>

<mosaic_0001>
module attributes {stable_mosaic.version = 11 : i64} {
  func.func @attention_kernel(%arg0: i32, %arg1: memref<8x256xf32, #tpu.memory_space<vmem>>, %arg2: memref<1x8xf32, #tpu.memory_space<vmem>>, %arg3: memref<1x8xf32, #tpu.memory_space<vmem>>, %arg4: memref<8x4xf32, #tpu.memory_space<vmem>>, %arg5: memref<1x4xf32, #tpu.memory_space<vmem>>, %arg6: memref<4x4xf32, #tpu.memory_space<vmem>>, %arg7: memref<8x4xf32, #tpu.memory_space<vmem>>) attributes {dimension_semantics = [#tpu.dimension_semantics<parallel>], iteration_bounds = array<i64: 1>, scalar_prefetch = 0 : i64, scratch_operands = 0 : i64, tpu.core_type = #tpu.core_type<tc>, window_params = [{transform_indices = @transform_0, window_bounds = array<i64: 8, 256>}, {pipeline_mode = #tpu.pipeline_mode<synchronous>, transform_indices = @transform_1, window_bounds = array<i64: 1, 8>}, {pipeline_mode = #tpu.pipeline_mode<synchronous>, transform_indices = @transform_2, window_bounds = array<i64: 1, 8>}, {pipeline_mode = #tpu.pipeline_mode<synchronous>, transform_indices = @transform_3, window_bounds = array<i64: 8, 4>}, {pipeline_mode = #tpu.pipeline_mode<synchronous>, transform_indices = @transform_4, window_bounds = array<i64: 1, 4>}, {pipeline_mode = #tpu.pipeline_mode<synchronous>, transform_indices = @transform_5, window_bounds = array<i64: 4, 4>}, {transform_indices = @transform_6, window_bounds = array<i64: 8, 4>}]} {
    %c0 = arith.constant 0 : index
    %c0_0 = arith.constant 0 : index
    %0 = vector.load %arg1[%c0, %c0_0] : memref<8x256xf32, #tpu.memory_space<vmem>>, vector<8x256xf32>
    %cst = arith.constant dense<0.000000e+00> : vector<8xf32>
    %1 = vector.multi_reduction <add>, %0, %cst [1] : vector<8x256xf32> to vector<8xf32>
    %2 = vector.shape_cast %1 : vector<8xf32> to vector<8x1xf32>
    %cst_1 = arith.constant 2.560000e+02 : f32
    %3 = vector.broadcast %cst_1 : f32 to vector<8x1xf32>
    %4 = arith.divf %2, %3 : vector<8x1xf32>
    %c0_2 = arith.constant 0 : index
    %c0_3 = arith.constant 0 : index
    %5 = vector.load %arg2[%c0_2, %c0_3] : memref<1x8xf32, #tpu.memory_space<vmem>>, vector<1x8xf32>
    %6 = vector.broadcast %4 : vector<8x1xf32> to vector<8x8xf32>
    %7 = vector.broadcast %5 : vector<1x8xf32> to vector<8x8xf32>
    %8 = arith.mulf %6, %7 : vector<8x8xf32>
    %c0_4 = arith.constant 0 : index
    %c0_5 = arith.constant 0 : index
    %9 = vector.load %arg3[%c0_4, %c0_5] : memref<1x8xf32, #tpu.memory_space<vmem>>, vector<1x8xf32>
    %10 = vector.broadcast %9 : vector<1x8xf32> to vector<8x8xf32>
    %11 = arith.addf %8, %10 : vector<8x8xf32>
    %12 = math.tanh %11 : vector<8x8xf32>
    %cst_6 = arith.constant 0.000000e+00 : f32
    %13 = vector.broadcast %cst_6 : f32 to vector<8x8xf32>
    %14 = arith.maximumf %12, %13 : vector<8x8xf32>
    %cst_7 = arith.constant 0.000000e+00 : f32
    %15 = vector.broadcast %cst_7 : f32 to vector<8x4xf32>
    %c0_8 = arith.constant 0 : index
    %c0_9 = arith.constant 0 : index
    %16 = vector.load %arg5[%c0_8, %c0_9] : memref<1x4xf32, #tpu.memory_space<vmem>>, vector<1x4xf32>
    %17 = vector.broadcast %16 : vector<1x4xf32> to vector<8x4xf32>
    %18 = arith.addf %15, %17 : vector<8x4xf32>
    %19 = vector.extract_strided_slice %14 {offsets = [0, 0], sizes = [8, 1], strides = [1, 1]} : vector<8x8xf32> to vector<8x1xf32>
    %c0_10 = arith.constant 0 : index
    %c0_11 = arith.constant 0 : index
    %20 = vector.load %arg4[%c0_10, %c0_11] : memref<8x4xf32, #tpu.memory_space<vmem>>, vector<1x4xf32>
    %21 = vector.broadcast %19 : vector<8x1xf32> to vector<8x4xf32>
    %22 = vector.broadcast %20 : vector<1x4xf32> to vector<8x4xf32>
    %23 = arith.mulf %21, %22 : vector<8x4xf32>
    %24 = arith.addf %18, %23 : vector<8x4xf32>
    %25 = vector.extract_strided_slice %14 {offsets = [0, 1], sizes = [8, 1], strides = [1, 1]} : vector<8x8xf32> to vector<8x1xf32>
    %c1 = arith.constant 1 : index
    %c0_12 = arith.constant 0 : index
    %26 = vector.load %arg4[%c1, %c0_12] : memref<8x4xf32, #tpu.memory_space<vmem>>, vector<1x4xf32>
    %27 = vector.broadcast %25 : vector<8x1xf32> to vector<8x4xf32>
    %28 = vector.broadcast %26 : vector<1x4xf32> to vector<8x4xf32>
    %29 = arith.mulf %27, %28 : vector<8x4xf32>
    %30 = arith.addf %24, %29 : vector<8x4xf32>
    %31 = vector.extract_strided_slice %14 {offsets = [0, 2], sizes = [8, 1], strides = [1, 1]} : vector<8x8xf32> to vector<8x1xf32>
    %c2 = arith.constant 2 : index
    %c0_13 = arith.constant 0 : index
    %32 = vector.load %arg4[%c2, %c0_13] : memref<8x4xf32, #tpu.memory_space<vmem>>, vector<1x4xf32>
    %33 = vector.broadcast %31 : vector<8x1xf32> to vector<8x4xf32>
    %34 = vector.broadcast %32 : vector<1x4xf32> to vector<8x4xf32>
    %35 = arith.mulf %33, %34 : vector<8x4xf32>
    %36 = arith.addf %30, %35 : vector<8x4xf32>
    %37 = vector.extract_strided_slice %14 {offsets = [0, 3], sizes = [8, 1], strides = [1, 1]} : vector<8x8xf32> to vector<8x1xf32>
    %c3 = arith.constant 3 : index
    %c0_14 = arith.constant 0 : index
    %38 = vector.load %arg4[%c3, %c0_14] : memref<8x4xf32, #tpu.memory_space<vmem>>, vector<1x4xf32>
    %39 = vector.broadcast %37 : vector<8x1xf32> to vector<8x4xf32>
    %40 = vector.broadcast %38 : vector<1x4xf32> to vector<8x4xf32>
    %41 = arith.mulf %39, %40 : vector<8x4xf32>
    %42 = arith.addf %36, %41 : vector<8x4xf32>
    %43 = vector.extract_strided_slice %14 {offsets = [0, 4], sizes = [8, 1], strides = [1, 1]} : vector<8x8xf32> to vector<8x1xf32>
    %c4 = arith.constant 4 : index
    %c0_15 = arith.constant 0 : index
    %44 = vector.load %arg4[%c4, %c0_15] : memref<8x4xf32, #tpu.memory_space<vmem>>, vector<1x4xf32>
    %45 = vector.broadcast %43 : vector<8x1xf32> to vector<8x4xf32>
    %46 = vector.broadcast %44 : vector<1x4xf32> to vector<8x4xf32>
    %47 = arith.mulf %45, %46 : vector<8x4xf32>
    %48 = arith.addf %42, %47 : vector<8x4xf32>
    %49 = vector.extract_strided_slice %14 {offsets = [0, 5], sizes = [8, 1], strides = [1, 1]} : vector<8x8xf32> to vector<8x1xf32>
    %c5 = arith.constant 5 : index
    %c0_16 = arith.constant 0 : index
    %50 = vector.load %arg4[%c5, %c0_16] : memref<8x4xf32, #tpu.memory_space<vmem>>, vector<1x4xf32>
    %51 = vector.broadcast %49 : vector<8x1xf32> to vector<8x4xf32>
    %52 = vector.broadcast %50 : vector<1x4xf32> to vector<8x4xf32>
    %53 = arith.mulf %51, %52 : vector<8x4xf32>
    %54 = arith.addf %48, %53 : vector<8x4xf32>
    %55 = vector.extract_strided_slice %14 {offsets = [0, 6], sizes = [8, 1], strides = [1, 1]} : vector<8x8xf32> to vector<8x1xf32>
    %c6 = arith.constant 6 : index
    %c0_17 = arith.constant 0 : index
    %56 = vector.load %arg4[%c6, %c0_17] : memref<8x4xf32, #tpu.memory_space<vmem>>, vector<1x4xf32>
    %57 = vector.broadcast %55 : vector<8x1xf32> to vector<8x4xf32>
    %58 = vector.broadcast %56 : vector<1x4xf32> to vector<8x4xf32>
    %59 = arith.mulf %57, %58 : vector<8x4xf32>
    %60 = arith.addf %54, %59 : vector<8x4xf32>
    %61 = vector.extract_strided_slice %14 {offsets = [0, 7], sizes = [8, 1], strides = [1, 1]} : vector<8x8xf32> to vector<8x1xf32>
    %c7 = arith.constant 7 : index
    %c0_18 = arith.constant 0 : index
    %62 = vector.load %arg4[%c7, %c0_18] : memref<8x4xf32, #tpu.memory_space<vmem>>, vector<1x4xf32>
    %63 = vector.broadcast %61 : vector<8x1xf32> to vector<8x4xf32>
    %64 = vector.broadcast %62 : vector<1x4xf32> to vector<8x4xf32>
    %65 = arith.mulf %63, %64 : vector<8x4xf32>
    %66 = arith.addf %60, %65 : vector<8x4xf32>
    %cst_19 = arith.constant dense<0xFF800000> : vector<8xf32>
    %67 = vector.multi_reduction <maximumf>, %66, %cst_19 [1] : vector<8x4xf32> to vector<8xf32>
    %68 = vector.shape_cast %67 : vector<8xf32> to vector<8x1xf32>
    %69 = vector.broadcast %68 : vector<8x1xf32> to vector<8x4xf32>
    %70 = arith.subf %66, %69 : vector<8x4xf32>
    %71 = math.exp %70 : vector<8x4xf32>
    %cst_20 = arith.constant dense<0.000000e+00> : vector<8xf32>
    %72 = vector.multi_reduction <add>, %71, %cst_20 [1] : vector<8x4xf32> to vector<8xf32>
    %73 = vector.shape_cast %72 : vector<8xf32> to vector<8x1xf32>
    %74 = tpu.reciprocal %73 {approx = true} : vector<8x1xf32> -> vector<8x1xf32>
    %75 = arith.mulf %73, %74 : vector<8x1xf32>
    %cst_21 = arith.constant 2.000000e+00 : f32
    %76 = vector.broadcast %cst_21 : f32 to vector<8x1xf32>
    %77 = arith.subf %76, %75 : vector<8x1xf32>
    %78 = arith.mulf %74, %77 : vector<8x1xf32>
    %79 = vector.broadcast %78 : vector<8x1xf32> to vector<8x4xf32>
    %80 = arith.mulf %71, %79 : vector<8x4xf32>
    %cst_22 = arith.constant 0.000000e+00 : f32
    %81 = vector.broadcast %cst_22 : f32 to vector<8x4xf32>
    %82 = vector.extract_strided_slice %80 {offsets = [0, 0], sizes = [8, 1], strides = [1, 1]} : vector<8x4xf32> to vector<8x1xf32>
    %c0_23 = arith.constant 0 : index
    %c0_24 = arith.constant 0 : index
    %83 = vector.load %arg6[%c0_23, %c0_24] : memref<4x4xf32, #tpu.memory_space<vmem>>, vector<1x4xf32>
    %84 = vector.broadcast %82 : vector<8x1xf32> to vector<8x4xf32>
    %85 = vector.broadcast %83 : vector<1x4xf32> to vector<8x4xf32>
    %86 = arith.mulf %84, %85 : vector<8x4xf32>
    %87 = arith.addf %81, %86 : vector<8x4xf32>
    %88 = vector.extract_strided_slice %80 {offsets = [0, 1], sizes = [8, 1], strides = [1, 1]} : vector<8x4xf32> to vector<8x1xf32>
    %c1_25 = arith.constant 1 : index
    %c0_26 = arith.constant 0 : index
    %89 = vector.load %arg6[%c1_25, %c0_26] : memref<4x4xf32, #tpu.memory_space<vmem>>, vector<1x4xf32>
    %90 = vector.broadcast %88 : vector<8x1xf32> to vector<8x4xf32>
    %91 = vector.broadcast %89 : vector<1x4xf32> to vector<8x4xf32>
    %92 = arith.mulf %90, %91 : vector<8x4xf32>
    %93 = arith.addf %87, %92 : vector<8x4xf32>
    %94 = vector.extract_strided_slice %80 {offsets = [0, 2], sizes = [8, 1], strides = [1, 1]} : vector<8x4xf32> to vector<8x1xf32>
    %c2_27 = arith.constant 2 : index
    %c0_28 = arith.constant 0 : index
    %95 = vector.load %arg6[%c2_27, %c0_28] : memref<4x4xf32, #tpu.memory_space<vmem>>, vector<1x4xf32>
    %96 = vector.broadcast %94 : vector<8x1xf32> to vector<8x4xf32>
    %97 = vector.broadcast %95 : vector<1x4xf32> to vector<8x4xf32>
    %98 = arith.mulf %96, %97 : vector<8x4xf32>
    %99 = arith.addf %93, %98 : vector<8x4xf32>
    %100 = vector.extract_strided_slice %80 {offsets = [0, 3], sizes = [8, 1], strides = [1, 1]} : vector<8x4xf32> to vector<8x1xf32>
    %c3_29 = arith.constant 3 : index
    %c0_30 = arith.constant 0 : index
    %101 = vector.load %arg6[%c3_29, %c0_30] : memref<4x4xf32, #tpu.memory_space<vmem>>, vector<1x4xf32>
    %102 = vector.broadcast %100 : vector<8x1xf32> to vector<8x4xf32>
    %103 = vector.broadcast %101 : vector<1x4xf32> to vector<8x4xf32>
    %104 = arith.mulf %102, %103 : vector<8x4xf32>
    %105 = arith.addf %99, %104 : vector<8x4xf32>
    %c0_31 = arith.constant 0 : index
    %c0_32 = arith.constant 0 : index
    %106 = vector.load %arg7[%c0_31, %c0_32] : memref<8x4xf32, #tpu.memory_space<vmem>>, vector<8x4xf32>
    tpu.vector_store %arg7[%c0_31, %c0_32], %105 {strides = array<i32>} : memref<8x4xf32, #tpu.memory_space<vmem>>, vector<8x4xf32>,
    return
  }
  func.func @transform_0(%arg0: i32) -> (i32, i32) {
    %c0_i32 = arith.constant 0 : i32
    %c0_i32_0 = arith.constant 0 : i32
    return %arg0, %c0_i32 : i32, i32
  }
  func.func @transform_1(%arg0: i32) -> (i32, i32) {
    %c0_i32 = arith.constant 0 : i32
    %c0_i32_0 = arith.constant 0 : i32
    %c0_i32_1 = arith.constant 0 : i32
    return %c0_i32, %c0_i32_0 : i32, i32
  }
  func.func @transform_2(%arg0: i32) -> (i32, i32) {
    %c0_i32 = arith.constant 0 : i32
    %c0_i32_0 = arith.constant 0 : i32
    %c0_i32_1 = arith.constant 0 : i32
    return %c0_i32, %c0_i32_0 : i32, i32
  }
  func.func @transform_3(%arg0: i32) -> (i32, i32) {
    %c0_i32 = arith.constant 0 : i32
    %c0_i32_0 = arith.constant 0 : i32
    %c0_i32_1 = arith.constant 0 : i32
    return %c0_i32, %c0_i32_0 : i32, i32
  }
  func.func @transform_4(%arg0: i32) -> (i32, i32) {
    %c0_i32 = arith.constant 0 : i32
    %c0_i32_0 = arith.constant 0 : i32
    %c0_i32_1 = arith.constant 0 : i32
    return %c0_i32, %c0_i32_0 : i32, i32
  }
  func.func @transform_5(%arg0: i32) -> (i32, i32) {
    %c0_i32 = arith.constant 0 : i32
    %c0_i32_0 = arith.constant 0 : i32
    %c0_i32_1 = arith.constant 0 : i32
    return %c0_i32, %c0_i32_0 : i32, i32
  }
  func.func @transform_6(%arg0: i32) -> (i32, i32) {
    %c0_i32 = arith.constant 0 : i32
    %c0_i32_0 = arith.constant 0 : i32
    return %arg0, %c0_i32 : i32, i32
  }
}

</mosaic_0001>

<bundles_post_ra>
// kernel: tpu_custom_call.1
= control target key start
LH: loop header
LB: loop body
LE: loop exit
PB: predicated region body
PF: predicated region fallthrough
CT: control target
= control target key end

     0   :  { %11 = vsyncpa [#allocation3], 0  ;;  %s288_s21 = smov [#allocation2]   ;;  %s391_s0 = inlined_call_operand.hbm [shape: f32[8,256], index: 0, kind: input, shape index: {}]   ;;  %s392_s1 = inlined_call_operand.vmem [shape: f32[1,8], index: 1, kind: input, shape index: {}]   ;;  %s393_s2 = inlined_call_operand.vmem [shape: f32[1,8], index: 2, kind: input, shape index: {}]   ;;  %s394_s3 = inlined_call_operand.vmem [shape: f32[8,4], index: 3, kind: input, shape index: {}]   ;;  %s395_s4 = inlined_call_operand.vmem [shape: f32[1,4], index: 4, kind: input, shape index: {}]   ;;  %s396_s5 = inlined_call_operand.vmem [shape: f32[4,4], index: 5, kind: input, shape index: {}]   ;;  %s397_s6 = inlined_call_operand.vmem [shape: f32[8,4], index: 6, kind: output, shape index: {}]  }
   0x1   :  { %s18_s22 = sshll.u32 %s288_s21, 4  ;;  %s19_s22 = int_to_ptr.vmem [resolvable:$true] %s18_s22 }
   0x2   :  { %s274_s23 = scalar_lea.vmem %s19_s22, 256  ;;  %p279_p1 = scmp.lt.s32.totalorder %s19_s22, %s19_s22 }
   0x3   :  { %p275_p0 = scmp.ne.s32.totalorder %s19_s22, %s274_s23  ;;  %p280_p2 = scmp.lt.s32.totalorder %s274_s23, %s274_s23 }
   0x5   :  { %p281_p3 = por %p280_p2, %p279_p1 }
   0x7   :  { %p282_p4 = pnand %p281_p3, %p275_p0 }
   0x9   :  { %285 = shalt.err (!%p282_p4)
}
   0xa   :  { %21 = dma.hbm_to_vmem [thread:$0]  %s391_s0, 256, %s19_s22, [#allocation3]  }
   0xb   :  { %286 = dma.done.wait [#allocation3], 256  }
   0xc   :  { %287 = vsyncadd [#allocation3], 4294967040  ;;  %v35_v0 = vld [vmem:[#allocation2] sm:$0xff]  ;;  %v36_v1 = vld [vmem:[#allocation2 + $0x8] sm:$0xff]  ;;  %v289_v3 = vmov 1   ;;  %v290_v4 = vmov 0  }
   0xd   :  { %v37_v2 = vadd.f32 %v36_v1, %v35_v0  ;;  %248 = vset.pattern.permute.xlu1 %v289_v3  ;;  %247 = vset.pattern.permute.xlu0 %v290_v4  ;;  %v223_v5 = vld [vmem:[%s392_s1] ss:$0 sm:$0xff]  ;;  %v291_v13 = vmov 2   ;;  %v292_v14 = vmov 3   ;;  %v293_v15 = vmov 4  }
   0xe   :  { %v224_v8 = vld [vmem:[%s393_s2] ss:$0 sm:$0xff]  ;;  %v294_v16 = vmov 5   ;;  %v295_v17 = vmov 6   ;;  %v296_v18 = vmov 7   ;;  %vm157_vm0 = vcmask 31744  }
   0xf   :  { %38 = vadd.xlane.f32.xlu0 %v37_v2  ;;  %v226_v21 = vld [vmem:[%s394_s3] ss:$0 sm:$0xff]  ;;  %v227_v26 = vld [vmem:[%s394_s3 + $0x1] ss:$0 sm:$0xff]  ;;  %v228_v29 = vld [vmem:[%s394_s3 + $0x2] ss:$0 sm:$0xff] }
  0x10   :  { %v225_v25 = vld [vmem:[%s395_s4] ss:$0 sm:$0xff]  ;;  %v229_v31 = vld [vmem:[%s394_s3 + $0x3] ss:$0 sm:$0xff]  ;;  %v230_v34 = vld [vmem:[%s394_s3 + $0x4] ss:$0 sm:$0xff] }
  0x11   :  { %v231_v37 = vld [vmem:[%s394_s3 + $0x5] ss:$0 sm:$0xff]  ;;  %v232_v40 = vld [vmem:[%s394_s3 + $0x6] ss:$0 sm:$0xff]  ;;  %v233_v46 = vld [vmem:[%s394_s3 + $0x7] ss:$0 sm:$0xff] }
  0x12   :  { %v235_v1 = vld [vmem:[%s396_s5 + $0x1] ss:$0 sm:$0xff] }
  0x98   :  { %v39_v6 = vpop.xlane.xlu0 %38 }
  0x99   :  { %v41_v7 = vmul.f32 0.00390625, %v39_v6 }
  0x9b   :  { %v49_v9 = vmul.f32 %v223_v5, %v41_v7 }
  0x9d   :  { %v57_v10 = vadd.f32 %v224_v8, %v49_v9  ;;  %v237_v9 = vld [vmem:[%s396_s5 + $0x3] ss:$0 sm:$0xff] }
  0x9f   :  { %260 = vtanh.f32 %v57_v10 }
  0xac   :  { %v261_v11 = vpop.eup %260 }
  0xad   :  { %v59_v12 = vmax.f32 %v261_v11, 0.0 }
  0xaf   :  { %82 = vperm.xlu1 %248, %v59_v12   ;;  %71 = vperm.xlu0 %247, %v59_v12  }
  0xb3   :  { %249 = vset.pattern.permute.xlu1 %v291_v13  ;;  %256 = vset.pattern.permute.xlu0 %v289_v3  ;;  %v234_v3 = vld [vmem:[%s396_s5] ss:$0 sm:$0xff] }
  0xb4   :  { %93 = vperm.xlu1 %249, %v59_v12  }
  0xb8   :  { %250 = vset.pattern.permute.xlu1 %v292_v14 }
  0xb9   :  { %104 = vperm.xlu1 %250, %v59_v12  }
  0xbd   :  { %251 = vset.pattern.permute.xlu1 %v293_v15 }
  0xbe   :  { %115 = vperm.xlu1 %251, %v59_v12  }
  0xc2   :  { %252 = vset.pattern.permute.xlu1 %v294_v16 }
  0xc3   :  { %126 = vperm.xlu1 %252, %v59_v12  }
  0xc7   :  { %253 = vset.pattern.permute.xlu1 %v295_v17 }
  0xc8   :  { %137 = vperm.xlu1 %253, %v59_v12  }
  0xcc   :  { %254 = vset.pattern.permute.xlu1 %v296_v18 }
  0xcd   :  { %148 = vperm.xlu1 %254, %v59_v12  }
  0xd1   :  { %255 = vset.pattern.permute.xlu1 %v290_v4  ;;  %v236_v4 = vld [vmem:[%s396_s5 + $0x2] ss:$0 sm:$0xff] }
 0x12a   :  { %v83_v19 = vpop.permute.xlu1 %82  ;;  %v72_v22 = vpop.permute.xlu0 %71 }
 0x12b   :  { %v78_v24 = vmul.f32 %v226_v21, %v72_v22  ;;  %v89_v30 = vmul.f32 %v227_v26, %v83_v19 }
 0x12d   :  { %v79_v27 = vadd.f32 %v225_v25, %v78_v24 }
 0x12f   :  { %v94_v20 = vpop.permute.xlu1 %93  ;;  %v90_v32 = vadd.f32 %v89_v30, %v79_v27 }
 0x130   :  { %v100_v33 = vmul.f32 %v228_v29, %v94_v20 }
 0x132   :  { %v101_v38 = vadd.f32 %v100_v33, %v90_v32 }
 0x134   :  { %v105_v23 = vpop.permute.xlu1 %104 }
 0x135   :  { %v111_v36 = vmul.f32 %v229_v31, %v105_v23 }
 0x137   :  { %v112_v41 = vadd.f32 %v111_v36, %v101_v38 }
 0x139   :  { %v116_v28 = vpop.permute.xlu1 %115 }
 0x13a   :  { %v122_v39 = vmul.f32 %v230_v34, %v116_v28 }
 0x13c   :  { %v123_v44 = vadd.f32 %v122_v39, %v112_v41 }
 0x13e   :  { %v127_v35 = vpop.permute.xlu1 %126 }
 0x13f   :  { %v133_v42 = vmul.f32 %v231_v37, %v127_v35 }
 0x141   :  { %v134_v47 = vadd.f32 %v133_v42, %v123_v44 }
 0x143   :  { %v138_v43 = vpop.permute.xlu1 %137 }
 0x144   :  { %v144_v45 = vmul.f32 %v232_v40, %v138_v43 }
 0x146   :  { %v145_v49 = vadd.f32 %v144_v45, %v134_v47 }
 0x148   :  { %v149_v48 = vpop.permute.xlu1 %148 }
 0x149   :  { %v155_v50 = vmul.f32 %v233_v46, %v149_v48 }
 0x14b   :  { %v156_v51 = vadd.f32 %v155_v50, %v145_v49 }
 0x14d   :  { %v158_v52 = vsel %vm157_vm0, %v156_v51, -inf }
 0x14e   :  { %159 = vmax.xlane.f32.xlu1 %v158_v52 }
 0x1d7   :  { %v160_v53 = vpop.xlane.xlu1 %159 }
 0x1d8   :  { %v161_v54 = vsub.f32 %v156_v51, %v160_v53 }
 0x1da   :  { %v162_v55 = vmul.f32 1.442695, %v161_v54 }
 0x1dc   :  { %262 = vpow2.f32 %v162_v55 }
 0x1e9   :  { %v263_v56 = vpop.eup %262 }
 0x1ea   :  { %v164_v57 = vsel %vm157_vm0, %v263_v56, 0.0 }
 0x1eb   :  { %165 = vadd.xlane.f32.xlu0 %v164_v57 }
 0x274   :  { %v166_v58 = vpop.xlane.xlu0 %165 }
 0x275   :  { %264 = vrcp.f32 %v166_v58 }
 0x282   :  { %v265_v59 = vpop.eup %264 }
 0x283   :  { %v168_v60 = vmul.f32 %v265_v59, %v166_v58 }
 0x285   :  { %v169_v61 = vsub.f32 2.0, %v168_v60 }
 0x287   :  { %v170_v62 = vmul.f32 %v265_v59, %v169_v61 }
 0x289   :  { %v171_v63 = vmul.f32 %v263_v56, %v170_v62 }
 0x28b   :  { %186 = vperm.xlu0 %256, %v171_v63   ;;  %175 = vperm.xlu1 %255, %v171_v63  }
 0x28f   :  { %257 = vset.pattern.permute.xlu1 %v291_v13  ;;  %259 = vset.pattern.permute.xlu0 %v292_v14 }
 0x290   :  { %197 = vperm.xlu1 %257, %v171_v63  }
 0x294   :  { %258 = vset.pattern.permute.xlu1 %v292_v14 }
 0x295   :  { %208 = vperm.xlu1 %258, %v171_v63  }
 0x306   :  { %v176_v0 = vpop.permute.xlu1 %175  ;;  %v187_v2 = vpop.permute.xlu0 %186 }
 0x307   :  { %v193_v5 = vmul.f32 %v235_v1, %v187_v2  ;;  %v182_v6 = vmul.f32 %v234_v3, %v176_v0 }
 0x309   :  { %v194_v10 = vadd.f32 %v193_v5, %v182_v6 }
 0x30b   :  { %v198_v7 = vpop.permute.xlu1 %197 }
 0x30c   :  { %v204_v8 = vmul.f32 %v236_v4, %v198_v7 }
 0x30e   :  { %v205_v12 = vadd.f32 %v204_v8, %v194_v10 }
 0x310   :  { %v209_v11 = vpop.permute.xlu1 %208 }
 0x311   :  { %v215_v13 = vmul.f32 %v237_v9, %v209_v11 }
 0x313   :  { %v216_v14 = vadd.f32 %v215_v13, %v205_v12 }
 0x315   :  { %217 = vst.msk [vmem:[%s397_s6] sm:$0xff] %vm157_vm0, %v216_v14 }
 0x316   :  { %222 = vsyncpa [#allocation3], 1 }

</bundles_post_ra>
